<compile_context>
chip_gen: v7x
topology: tpu7x:2x2x1
jax: 0.10.0
libtpu: 0.0.40
codegen_flags: <defaults>
</compile_context>

<pallas_src>
import functools

import jax
import jax.numpy as jnp
from jax import lax
from jax.experimental import pallas as pl
from jax.experimental.pallas import tpu as pltpu


def _round_up(n, m):
    return ((n + m - 1) // m) * m


def _cdiv(n, m):
    return (n + m - 1) // m


def _discriminator_kernel(x_ref, w1_ref, b1_ref, w2_ref, b2_ref, o_ref):
    """One batch tile of sigmoid(relu(x @ W1.T + b1) @ W2.T + b2).

    x : (TB, 8)  f32   (native PyTorch layout; batch on sublanes)
    w1: (128, 8) f32   (Linear(8,128).weight, VMEM-resident)
    b1: (128, 1) f32   (VMEM-resident)
    w2: (1, 128) f32   (Linear(128,1).weight, VMEM-resident)
    b2: (1,)     f32   (SMEM scalar)
    o : (1, TB)  f32   (batch lane-dense output slab)
    """
    # Layer 1 on the MXU with an implicit rhs transpose (q @ k.T pattern):
    #   (128, 8) . (TB, 8)^T -> (128, TB).
    # Batch ends up on the 128-lane axis, so all downstream math is lane-dense.
    h = lax.dot_general(
        w1_ref[...], x_ref[...],
        dimension_numbers=(((1,), (1,)), ((), ())),
        preferred_element_type=jnp.float32)            # (128, TB) f32
    # Bias + ReLU: the only remaining VPU passes over the hidden.
    h = jnp.maximum(h + b1_ref[...], 0.0)
    # Layer 2 (128 -> 1) also on the MXU instead of VPU mul + 128-deep reduce:
    #   (1, 128) @ (128, TB) -> (1, TB).
    z = jnp.dot(w2_ref[...], h, preferred_element_type=jnp.float32)
    z = z + b2_ref[0]                                   # scalar bias from SMEM
    o_ref[...] = jax.nn.sigmoid(z).astype(o_ref.dtype)  # EUP, lane-dense


def _choose_tile(batch, cap):
    """Batch tile (multiple of 128, or == batch for small exact cases)."""
    cap = max(128, _round_up(cap, 128))
    if batch % 8 == 0 and batch <= 256:
        return batch                                  # single exact block
    if batch > 256:
        # >= 2 grid steps so the "parallel" axis can use both v7x TensorCores,
        # capped so double-buffered tiles + the (128, TB) hidden stay in VMEM.
        return min(cap, _round_up(_cdiv(batch, 2), 128))
    return min(cap, _round_up(batch, 128))


@functools.partial(jax.jit, static_argnames=("tb_cap",))
def discriminator_forward(x, w1, b1, w2, b2, *, tb_cap=8192):
    """Forward pass of the Discriminator.

    x : (B, 8) float32
    w1: (128, 8)  -- PyTorch Linear(8, 128).weight layout (out, in)
    b1: (128,)
    w2: (1, 128)  -- PyTorch Linear(128, 1).weight layout (out, in)
    b2: (1,)
    returns (B, 1) float32 = sigmoid(relu(x @ w1.T + b1) @ w2.T + b2)
    """
    B = x.shape[0]
    tb = _choose_tile(B, tb_cap)
    n_blocks = _cdiv(B, tb)   # partial trailing block handled by Pallas masking

    x_f = x.astype(jnp.float32)                        # (B, 8), no transpose/pad
    w1_f = w1.astype(jnp.float32)                      # (128, 8)
    b1_col = b1.reshape(128, 1).astype(jnp.float32)    # (128, 1)
    w2_row = w2.reshape(1, 128).astype(jnp.float32)    # (1, 128)
    b2_s = b2.reshape(1).astype(jnp.float32)           # (1,) -> SMEM

    cost = pl.CostEstimate(
        flops=2 * B * 8 * 128 + 2 * B * 128,
        transcendentals=B,
        bytes_accessed=B * 8 * 4 + B * 4 + 128 * 8 * 4 + 128 * 4 + 128 * 4 + 4,
    )

    out_t = pl.pallas_call(
        _discriminator_kernel,
        out_shape=jax.ShapeDtypeStruct((1, B), jnp.float32),
        grid=(n_blocks,),
        in_specs=[
            pl.BlockSpec((tb, 8), lambda i: (i, 0)),      # x tile (pipelined)
            pl.BlockSpec((128, 8), lambda i: (0, 0)),     # W1 (resident)
            pl.BlockSpec((128, 1), lambda i: (0, 0)),     # b1 (resident)
            pl.BlockSpec((1, 128), lambda i: (0, 0)),     # W2 row (resident)
            pl.BlockSpec(memory_space=pltpu.MemorySpace.SMEM),  # b2 scalar
        ],
        out_specs=pl.BlockSpec((1, tb), lambda i: (0, i)),  # lane-dense output
        compiler_params=pltpu.CompilerParams(
            dimension_semantics=("parallel",),
            vmem_limit_bytes=48 * 1024 * 1024,
        ),
        cost_estimate=cost,
    )(x_f, w1_f, b1_col, w2_row, b2_s)

    # (1, B) -> (B, 1): contiguous, metadata-only reshape.
    return out_t.reshape(B, 1)


def init_params(key):
    """Deterministic synthetic parameters in PyTorch nn.Linear layouts."""
    k1, k2, k3, k4 = jax.random.split(key, 4)
    w1 = jax.random.normal(k1, (128, 8), jnp.float32) * 0.1   # Linear(8,128).weight
    b1 = jax.random.normal(k2, (128,), jnp.float32) * 0.1     # Linear(8,128).bias
    w2 = jax.random.normal(k3, (1, 128), jnp.float32) * 0.1   # Linear(128,1).weight
    b2 = jax.random.normal(k4, (1,), jnp.float32) * 0.1       # Linear(128,1).bias
    return w1, b1, w2, b2


if __name__ == "__main__":
    key = jax.random.PRNGKey(0)
    kx, kp = jax.random.split(key)

    B = 64  # small batch; kernel handles it as a single exact block
    x = jax.random.normal(kx, (B, 8), jnp.float32)
    w1, b1, w2, b2 = init_params(kp)

    out = discriminator_forward(x, w1, b1, w2, b2)
    out = jax.block_until_ready(out)

    # Reference in plain f32 JAX (same math as the PyTorch forward).
    ref = jax.nn.sigmoid(jnp.maximum(x @ w1.T + b1, 0.0) @ w2.T + b2)
    assert out.shape == (B, 1)
    # All-f32 MXU path; tolerance covers any multi-pass f32 matmul rounding.
    assert jnp.allclose(out, ref, atol=1e-3, rtol=1e-3), (
        float(jnp.max(jnp.abs(out - ref))))

    print("KERNEL_OK")
</pallas_src>

<mosaic_0001>
module attributes {stable_mosaic.version = 11 : i64} {
  func.func @_discriminator_kernel(%arg0: i32, %arg1: memref<64x8xf32, #tpu.memory_space<vmem>>, %arg2: memref<128x8xf32, #tpu.memory_space<vmem>>, %arg3: memref<128x1xf32, #tpu.memory_space<vmem>>, %arg4: memref<1x128xf32, #tpu.memory_space<vmem>>, %arg5: memref<1xf32, #tpu.memory_space<smem>>, %arg6: memref<1x64xf32, #tpu.memory_space<vmem>>) attributes {dimension_semantics = [#tpu.dimension_semantics<parallel>], iteration_bounds = array<i64: 1>, scalar_prefetch = 0 : i64, scratch_operands = 0 : i64, tpu.core_type = #tpu.core_type<tc>, window_params = [{transform_indices = @transform_0, window_bounds = array<i64: 64, 8>}, {pipeline_mode = #tpu.pipeline_mode<synchronous>, transform_indices = @transform_1, window_bounds = array<i64: 128, 8>}, {pipeline_mode = #tpu.pipeline_mode<synchronous>, transform_indices = @transform_2, window_bounds = array<i64: 128, 1>}, {pipeline_mode = #tpu.pipeline_mode<synchronous>, transform_indices = @transform_3, window_bounds = array<i64: 1, 128>}, {transform_indices = @transform_4, window_bounds = array<i64: 1>}, {transform_indices = @transform_5, window_bounds = array<i64: 1, 64>}]} {
    %c0 = arith.constant 0 : index
    %c0_0 = arith.constant 0 : index
    %0 = vector.load %arg2[%c0, %c0_0] : memref<128x8xf32, #tpu.memory_space<vmem>>, vector<128x8xf32>
    %c0_1 = arith.constant 0 : index
    %c0_2 = arith.constant 0 : index
    %1 = vector.load %arg1[%c0_1, %c0_2] : memref<64x8xf32, #tpu.memory_space<vmem>>, vector<64x8xf32>
    %cst = arith.constant dense<0.000000e+00> : vector<128x64xf32>
    %2 = tpu.matmul %0, %1, %cst {dimension_numbers = #tpu.dot_dimension_numbers<[1], [1], [0], [0], [0, 0, 1, 0], [], []>} : vector<128x8xf32>, vector<64x8xf32>, vector<128x64xf32> -> vector<128x64xf32>
    %c0_3 = arith.constant 0 : index
    %c0_4 = arith.constant 0 : index
    %3 = vector.load %arg3[%c0_3, %c0_4] : memref<128x1xf32, #tpu.memory_space<vmem>>, vector<128x1xf32>
    %4 = vector.broadcast %3 : vector<128x1xf32> to vector<128x64xf32>
    %5 = arith.addf %2, %4 : vector<128x64xf32>
    %cst_5 = arith.constant 0.000000e+00 : f32
    %6 = vector.broadcast %cst_5 : f32 to vector<128x64xf32>
    %7 = arith.maximumf %5, %6 : vector<128x64xf32>
    %c0_6 = arith.constant 0 : index
    %c0_7 = arith.constant 0 : index
    %8 = vector.load %arg4[%c0_6, %c0_7] : memref<1x128xf32, #tpu.memory_space<vmem>>, vector<1x128xf32>
    %cst_8 = arith.constant dense<0.000000e+00> : vector<1x64xf32>
    %9 = tpu.matmul %8, %7, %cst_8 {dimension_numbers = #tpu.dot_dimension_numbers<[1], [0], [0], [1], [0, 0, 1, 1], [], []>} : vector<1x128xf32>, vector<128x64xf32>, vector<1x64xf32> -> vector<1x64xf32>
    %c0_9 = arith.constant 0 : index
    %10 = memref.load %arg5[%c0_9] : memref<1xf32, #tpu.memory_space<smem>>
    %11 = vector.broadcast %10 : f32 to vector<1x64xf32>
    %12 = arith.addf %9, %11 : vector<1x64xf32>
    %13 = arith.negf %12 : vector<1x64xf32>
    %14 = math.exp %13 : vector<1x64xf32>
    %cst_10 = arith.constant 1.000000e+00 : f32
    %15 = vector.broadcast %cst_10 : f32 to vector<1x64xf32>
    %16 = arith.addf %15, %14 : vector<1x64xf32>
    %17 = arith.divf %15, %16 : vector<1x64xf32>
    %c0_11 = arith.constant 0 : index
    %c0_12 = arith.constant 0 : index
    %18 = vector.load %arg6[%c0_11, %c0_12] : memref<1x64xf32, #tpu.memory_space<vmem>>, vector<1x64xf32>
    tpu.vector_store %arg6[%c0_11, %c0_12], %17 {strides = array<i32>} : memref<1x64xf32, #tpu.memory_space<vmem>>, vector<1x64xf32>,
    return
  }
  func.func @transform_0(%arg0: i32) -> (i32, i32) {
    %c0_i32 = arith.constant 0 : i32
    %c0_i32_0 = arith.constant 0 : i32
    return %arg0, %c0_i32 : i32, i32
  }
  func.func @transform_1(%arg0: i32) -> (i32, i32) {
    %c0_i32 = arith.constant 0 : i32
    %c0_i32_0 = arith.constant 0 : i32
    %c0_i32_1 = arith.constant 0 : i32
    return %c0_i32, %c0_i32_0 : i32, i32
  }
  func.func @transform_2(%arg0: i32) -> (i32, i32) {
    %c0_i32 = arith.constant 0 : i32
    %c0_i32_0 = arith.constant 0 : i32
    %c0_i32_1 = arith.constant 0 : i32
    return %c0_i32, %c0_i32_0 : i32, i32
  }
  func.func @transform_3(%arg0: i32) -> (i32, i32) {
    %c0_i32 = arith.constant 0 : i32
    %c0_i32_0 = arith.constant 0 : i32
    %c0_i32_1 = arith.constant 0 : i32
    return %c0_i32, %c0_i32_0 : i32, i32
  }
  func.func @transform_4(%arg0: i32) -> i32 {
    %c0_i32 = arith.constant 0 : i32
    %c0_i32_0 = arith.constant 0 : i32
    return %c0_i32 : i32
  }
  func.func @transform_5(%arg0: i32) -> (i32, i32) {
    %c0_i32 = arith.constant 0 : i32
    %c0_i32_0 = arith.constant 0 : i32
    return %c0_i32, %arg0 : i32, i32
  }
}

</mosaic_0001>

<bundles_post_ra>
// kernel: discriminator_forward.1
= control target key start
LH: loop header
LB: loop body
LE: loop exit
PB: predicated region body
PF: predicated region fallthrough
CT: control target
= control target key end

     0   :  { %vm142_vm0 = vcmask 64512   ;;  %v695_v6 = vmov 0   ;;  %s914_s0 = inlined_call_operand.vmem [shape: f32[64,8], index: 0, kind: input, shape index: {}]   ;;  %s915_s1 = inlined_call_operand.vmem [shape: f32[128,8], index: 1, kind: input, shape index: {}]   ;;  %s916_s2 = inlined_call_operand.vmem [shape: f32[128,1], index: 2, kind: input, shape index: {}]   ;;  %s917_s3 = inlined_call_operand.vmem [shape: f32[1,128], index: 3, kind: input, shape index: {}]   ;;  %s918_s4 = inlined_call_operand.<no memory space> [shape: f32[1], index: 4, kind: input, shape index: {}]   ;;  %s919_s5 = inlined_call_operand.hbm [shape: f32[1,64], index: 5, kind: output, shape index: {}]  }
   0x1   :  { %v38_v0 = vld [vmem:[%s914_s0] sm:$0xff]  ;;  %v39_v1 = vld [vmem:[%s914_s0 + $0x8] sm:$0xff]  ;;  %v40_v2 = vld [vmem:[%s914_s0 + $0x10] sm:$0xff]  ;;  %665 = vset.pattern.permute.xlu0 %v695_v6  ;;  %666 = vset.pattern.permute.xlu1 %v695_v6 }
   0x2   :  { %v612_v3 = vpack.c.bf16 %v39_v1, %v38_v0  ;;  %vm741_vm1 = vmpackc.low %vm142_vm0, %vm142_vm0  ;;  %v41_v5 = vld [vmem:[%s914_s0 + $0x18] sm:$0xff]  ;;  %v22_v8 = vld [vmem:[%s915_s1] sm:$0xff] }
   0x3   :  { %v618_v7 = vpack.c.bf16 %v41_v5, %v40_v2  ;;  %553 = vmatprep.mubr.msk.f32.mxu0 %vm142_vm0, %v22_v8  ;;  %v42_v9 = vld [vmem:[%s914_s0 + $0x20] sm:$0xff]  ;;  %v43_v10 = vld [vmem:[%s914_s0 + $0x28] sm:$0xff]  ;;  %v48_v12 = vld [vmem:[%s916_s2 + $0x10] sm:$0xff] }
   0x4   :  { %614 = vmatprep.subr.msk.bf16.mxu0 %vm741_vm1, %v612_v3  ;;  %v46_v11 = vld [vmem:[%s916_s2] sm:$0xff]  ;;  %v624_v13 = vpack.c.bf16 %v43_v10, %v42_v9  ;;  %74 = vperm.xlu1 %666, %v48_v12   ;;  %v47_v14 = vld [vmem:[%s916_s2 + $0x8] sm:$0xff]  ;;  %v49_v15 = vld [vmem:[%s916_s2 + $0x18] sm:$0xff] }
   0x5   :  { %617 = vmatpush3.bf16.xpose.msk.msra.mxu0 %vm741_vm1, %v612_v3  ;;  %64 = vperm.xlu0 %665, %v46_v11  }
   0x6   :  { %620 = vmatprep.subr.msk.bf16.mxu0 %vm741_vm1, %v618_v7 }
   0x9   :  { %69 = vperm.xlu0 %665, %v47_v14  }
   0xd   :  { %623 = vmatpush3.bf16.xpose.msk.msra.mxu0 %vm741_vm1, %v618_v7 }
   0xe   :  { %626 = vmatprep.subr.msk.bf16.mxu0 %vm741_vm1, %v624_v13 }
   0xf   :  { %11 = vsyncpa [#allocation4], 0  ;;  %v44_v16 = vld [vmem:[%s914_s0 + $0x30] sm:$0xff]  ;;  %v45_v17 = vld [vmem:[%s914_s0 + $0x38] sm:$0xff]  ;;  %79 = vperm.xlu1 %666, %v49_v15   ;;  %v696_v46 = vmov 0.0|0.0   ;;  %vm697_vm2 = vmmov 0  }
  0x10   :  { %v50_v18 = vld [vmem:[%s916_s2 + $0x20] sm:$0xff]  ;;  %v51_v19 = vld [vmem:[%s916_s2 + $0x28] sm:$0xff]  ;;  %v630_v20 = vpack.c.bf16 %v45_v17, %v44_v16  ;;  %v52_v21 = vld [vmem:[%s916_s2 + $0x30] sm:$0xff]  ;;  %636 = vmatprep.subr.bf16.mxu1 %v696_v46  ;;  %v698_v47 = vmov 0.0   ;;  %s699_s23 = smov [#allocation3]   ;;  %vm455_vm3 = vcmask 516096  }
  0x11   :  { %84 = vperm.xlu0 %665, %v50_v18   ;;  %v53_v22 = vld [vmem:[%s916_s2 + $0x38] sm:$0xff]  ;;  %v54_v23 = vld [vmem:[%s916_s2 + $0x40] sm:$0xff]  ;;  %v55_v24 = vld [vmem:[%s916_s2 + $0x48] sm:$0xff]  ;;  %609 = vmatprep.mubr.msk.f32.mxu1 %vm697_vm2, %v698_v47  ;;  %s463_s24 = sshll.u32 %s699_s23, 4  ;;  %s464_s24 = int_to_ptr.vmem [resolvable:$true] %s463_s24 }
  0x12   :  { %v56_v25 = vld [vmem:[%s916_s2 + $0x50] sm:$0xff]  ;;  %v57_v26 = vld [vmem:[%s916_s2 + $0x58] sm:$0xff]  ;;  %v58_v27 = vld [vmem:[%s916_s2 + $0x60] sm:$0xff]  ;;  %s675_s25 = scalar_lea.vmem %s464_s24, 32  ;;  %p676_p1 = scmp.lt.s32.totalorder %s464_s24, %s464_s24 }
  0x13   :  { %89 = vperm.xlu1 %666, %v51_v19   ;;  %v59_v28 = vld [vmem:[%s916_s2 + $0x68] sm:$0xff]  ;;  %v24_v30 = vld [vmem:[%s915_s1 + $0x10] sm:$0xff]  ;;  %v61_v32 = vld [vmem:[%s916_s2 + $0x78] sm:$0xff] }
  0x14   :  { %v23_v29 = vld [vmem:[%s915_s1 + $0x8] sm:$0xff]  ;;  %v60_v31 = vld [vmem:[%s916_s2 + $0x70] sm:$0xff]  ;;  %v25_v33 = vld [vmem:[%s915_s1 + $0x18] sm:$0xff] }
  0x15   :  { %629 = vmatpush3.bf16.xpose.msk.msra.mxu0 %vm741_vm1, %v624_v13  ;;  %94 = vperm.xlu0 %665, %v52_v21   ;;  %v26_v34 = vld [vmem:[%s915_s1 + $0x20] sm:$0xff]  ;;  %v27_v35 = vld [vmem:[%s915_s1 + $0x28] sm:$0xff]  ;;  %v28_v36 = vld [vmem:[%s915_s1 + $0x30] sm:$0xff] }
  0x16   :  { %632 = vmatprep.subr.msk.bf16.mxu0 %vm741_vm1, %v630_v20  ;;  %v29_v37 = vld [vmem:[%s915_s1 + $0x38] sm:$0xff]  ;;  %v30_v38 = vld [vmem:[%s915_s1 + $0x40] sm:$0xff]  ;;  %v31_v39 = vld [vmem:[%s915_s1 + $0x48] sm:$0xff] }
  0x17   :  { %99 = vperm.xlu1 %666, %v53_v22   ;;  %v32_v40 = vld [vmem:[%s915_s1 + $0x50] sm:$0xff]  ;;  %v33_v41 = vld [vmem:[%s915_s1 + $0x58] sm:$0xff]  ;;  %v34_v42 = vld [vmem:[%s915_s1 + $0x60] sm:$0xff] }
  0x18   :  { %v35_v43 = vld [vmem:[%s915_s1 + $0x68] sm:$0xff]  ;;  %v36_v44 = vld [vmem:[%s915_s1 + $0x70] sm:$0xff]  ;;  %v37_v45 = vld [vmem:[%s915_s1 + $0x78] sm:$0xff] }
  0x19   :  { %104 = vperm.xlu0 %665, %v54_v23  }
  0x1b   :  { %109 = vperm.xlu1 %666, %v55_v24  }
  0x1d   :  { %635 = vmatpush3.bf16.xpose.msk.msra.mxu0 %vm741_vm1, %v630_v20  ;;  %114 = vperm.xlu0 %665, %v56_v25  }
  0x1f   :  { %119 = vperm.xlu1 %666, %v57_v26  }
  0x21   :  { %124 = vperm.xlu0 %665, %v58_v27  }
  0x23   :  { %129 = vperm.xlu1 %666, %v59_v28  }
  0x24   :  { %554 = vmatmul.mubr.msk.f32.vlgmr.msra.gmra.mrb[0].mxu0 %vm142_vm0, %v23_v29 }
  0x25   :  { %556 = vmatprep.mubr.msk.f32.mxu0 %vm142_vm0, %v24_v30  ;;  %134 = vperm.xlu0 %665, %v60_v31  }
  0x27   :  { %139 = vperm.xlu1 %666, %v61_v32  }
  0x28   :  { %557 = vmatmul.mubr.msk.f32.gmra.mrb[2].mxu0 %vm142_vm0, %v25_v33 }
  0x29   :  { %559 = vmatprep.mubr.msk.f32.mxu0 %vm142_vm0, %v26_v34 }
  0x2c   :  { %560 = vmatmul.mubr.msk.f32.gmra.mrb[4].mxu0 %vm142_vm0, %v27_v35 }
  0x2d   :  { %562 = vmatprep.mubr.msk.f32.mxu0 %vm142_vm0, %v28_v36 }
  0x30   :  { %563 = vmatmul.mubr.msk.f32.gmra.mrb[6].mxu0 %vm142_vm0, %v29_v37 }
  0x31   :  { %565 = vmatprep.mubr.msk.f32.mxu0 %vm142_vm0, %v30_v38 }
  0x34   :  { %566 = vmatmul.mubr.msk.f32.gmra.mrb[8].mxu0 %vm142_vm0, %v31_v39 }
  0x35   :  { %568 = vmatprep.mubr.msk.f32.mxu0 %vm142_vm0, %v32_v40 }
  0x38   :  { %569 = vmatmul.mubr.msk.f32.gmra.mrb[10].mxu0 %vm142_vm0, %v33_v41 }
  0x39   :  { %571 = vmatprep.mubr.msk.f32.mxu0 %vm142_vm0, %v34_v42 }
  0x3c   :  { %572 = vmatmul.mubr.msk.f32.gmra.mrb[12].mxu0 %vm142_vm0, %v35_v43 }
  0x3d   :  { %574 = vmatprep.mubr.msk.f32.mxu0 %vm142_vm0, %v36_v44 }
  0x40   :  { %575 = vmatmul.mubr.msk.f32.gmra.mrb[14].mxu0 %vm142_vm0, %v37_v45 }
  0x83   :  { %v75_v48 = vpop.permute.xlu1 %74 }
  0x84   :  { %v65_v49 = vpop.permute.xlu0 %64 }
  0x88   :  { %v70_v51 = vpop.permute.xlu0 %69 }
  0x8e   :  { %v80_v50 = vpop.permute.xlu1 %79 }
  0x90   :  { %v85_v53 = vpop.permute.xlu0 %84 }
  0x92   :  { %v90_v52 = vpop.permute.xlu1 %89 }
  0x94   :  { %v95_v62 = vpop.permute.xlu0 %94 }
  0x96   :  { %v100_v59 = vpop.permute.xlu1 %99 }
  0x98   :  { %v105_v11 = vpop.permute.xlu0 %104 }
  0x9a   :  { %v110_v8 = vpop.permute.xlu1 %109 }
  0x9c   :  { %v115_v23 = vpop.permute.xlu0 %114 }
  0x9e   :  { %v120_v20 = vpop.permute.xlu1 %119 }
  0xa0   :  { %v125_v36 = vpop.permute.xlu0 %124 }
  0xa2   :  { %v130_v33 = vpop.permute.xlu1 %129 }
  0xa6   :  { %v140_v45 = vpop.permute.xlu1 %139 }
  0xf7   :  { %v555_v54 = vpop.f32.mrb[0].mxu0 }
  0xf8   :  { %v287_v55 = vadd.f32 %v555_v54, %v70_v51  ;;  %v281_v56 = vpop.f32.mrb[1].mxu0 }
  0xf9   :  { %v282_v57 = vadd.f32 %v281_v56, %v65_v49  ;;  %v135_v49 = vpop.permute.xlu0 %134 }
  0xfa   :  { %v361_v58 = vmax.f32 %v287_v55, 0.0 }
  0xfb   :  { %v360_v60 = vmax.f32 %v282_v57, 0.0  ;;  %v558_v61 = vpop.f32.mrb[2].mxu0  ;;  %v376_v57 = vld [vmem:[%s917_s3] sm:$0x1]  ;;  %s671_s3 = scalar_lea.vmem %s464_s24, 16 }
  0xfc   :  { %v297_v63 = vadd.f32 %v558_v61, %v80_v50  ;;  %v291_v0 = vpop.f32.mrb[3].mxu0  ;;  %p672_p0 = scmp.ne.s32.totalorder %s464_s24, %s671_s3  ;;  %p677_p2 = scmp.lt.s32.totalorder %s675_s25, %s671_s3 }
  0xfd   :  { %v292_v1 = vadd.f32 %v291_v0, %v75_v48  ;;  %v637_v2 = vpack.c.bf16 %v361_v58, %v360_v60  ;;  %v378_v58 = vstv %s918_s4 }
  0xfe   :  { %v363_v3 = vmax.f32 %v297_v63, 0.0  ;;  %p678_p3 = por %p677_p2, %p676_p1 }
  0xff   :  { %v362_v4 = vmax.f32 %v292_v1, 0.0  ;;  %v561_v5 = vpop.f32.mrb[4].mxu0  ;;  %638 = vmatpush3.bf16.msra.mxu1 %v637_v2 }
 0x100   :  { %v307_v6 = vadd.f32 %v561_v5, %v90_v52  ;;  %v301_v7 = vpop.f32.mrb[5].mxu0  ;;  %639 = vmatprep.subr.bf16.mxu1 %v696_v46  ;;  %p679_p4 = pnand %p678_p3, %p672_p0 }
 0x101   :  { %v640_v9 = vpack.c.bf16 %v363_v3, %v362_v4  ;;  %v302_v10 = vadd.f32 %v301_v7, %v85_v53 }
 0x102   :  { %v365_v12 = vmax.f32 %v307_v6, 0.0 }
 0x103   :  { %v364_v13 = vmax.f32 %v302_v10, 0.0  ;;  %v564_v14 = vpop.f32.mrb[6].mxu0  ;;  %641 = vmatpush3.bf16.msra.mxu1 %v640_v9 }
 0x104   :  { %v317_v15 = vadd.f32 %v564_v14, %v100_v59  ;;  %v311_v16 = vpop.f32.mrb[7].mxu0  ;;  %642 = vmatprep.subr.bf16.mxu1 %v696_v46 }
 0x105   :  { %v643_v17 = vpack.c.bf16 %v365_v12, %v364_v13  ;;  %v312_v18 = vadd.f32 %v311_v16, %v95_v62 }
 0x106   :  { %v367_v19 = vmax.f32 %v317_v15, 0.0 }
 0x107   :  { %v366_v21 = vmax.f32 %v312_v18, 0.0  ;;  %v567_v22 = vpop.f32.mrb[8].mxu0  ;;  %644 = vmatpush3.bf16.msra.mxu1 %v643_v17 }
 0x108   :  { %v327_v24 = vadd.f32 %v567_v22, %v110_v8  ;;  %v321_v25 = vpop.f32.mrb[9].mxu0  ;;  %645 = vmatprep.subr.bf16.mxu1 %v696_v46 }
 0x109   :  { %v646_v26 = vpack.c.bf16 %v367_v19, %v366_v21  ;;  %v322_v27 = vadd.f32 %v321_v25, %v105_v11 }
 0x10a   :  { %v369_v28 = vmax.f32 %v327_v24, 0.0 }
 0x10b   :  { %v368_v29 = vmax.f32 %v322_v27, 0.0  ;;  %v570_v30 = vpop.f32.mrb[10].mxu0  ;;  %647 = vmatpush3.bf16.msra.mxu1 %v646_v26 }
 0x10c   :  { %v337_v31 = vadd.f32 %v570_v30, %v120_v20  ;;  %v331_v32 = vpop.f32.mrb[11].mxu0  ;;  %648 = vmatprep.subr.bf16.mxu1 %v696_v46 }
 0x10d   :  { %v649_v34 = vpack.c.bf16 %v369_v28, %v368_v29  ;;  %v332_v35 = vadd.f32 %v331_v32, %v115_v23 }
 0x10e   :  { %v371_v37 = vmax.f32 %v337_v31, 0.0 }
 0x10f   :  { %v370_v38 = vmax.f32 %v332_v35, 0.0  ;;  %v573_v39 = vpop.f32.mrb[12].mxu0  ;;  %650 = vmatpush3.bf16.msra.mxu1 %v649_v34 }
 0x110   :  { %v347_v40 = vadd.f32 %v573_v39, %v130_v33  ;;  %v341_v41 = vpop.f32.mrb[13].mxu0  ;;  %651 = vmatprep.subr.bf16.mxu1 %v696_v46 }
 0x111   :  { %v652_v42 = vpack.c.bf16 %v371_v37, %v370_v38  ;;  %v342_v43 = vadd.f32 %v341_v41, %v125_v36 }
 0x112   :  { %v373_v44 = vmax.f32 %v347_v40, 0.0 }
 0x113   :  { %v372_v47 = vmax.f32 %v342_v43, 0.0  ;;  %v576_v48 = vpop.f32.mrb[14].mxu0  ;;  %653 = vmatpush3.bf16.msra.mxu1 %v652_v42 }
 0x114   :  { %v357_v50 = vadd.f32 %v576_v48, %v140_v45  ;;  %v351_v51 = vpop.f32.mrb[15].mxu0  ;;  %654 = vmatprep.subr.bf16.mxu1 %v696_v46 }
 0x115   :  { %v655_v52 = vpack.c.bf16 %v373_v44, %v372_v47  ;;  %v352_v53 = vadd.f32 %v351_v51, %v135_v49 }
 0x116   :  { %v375_v54 = vmax.f32 %v357_v50, 0.0 }
 0x117   :  { %v374_v55 = vmax.f32 %v352_v53, 0.0  ;;  %656 = vmatpush3.bf16.msra.mxu1 %v655_v52 }
 0x118   :  { %657 = vmatprep.subr.bf16.mxu1 %v696_v46 }
 0x119   :  { %v658_v56 = vpack.c.bf16 %v375_v54, %v374_v55 }
 0x11b   :  { %659 = vmatpush3.bf16.msra.mxu1 %v658_v56 }
 0x11e   :  { %610 = vmatmul.mubr.f32.vlgmr.msra.gmra.mrb[0].mxu1 %v376_v57 }
 0x1f1   :  { %v445_v59 = vpop.f32.mrb[0].mxu1 }
 0x1f2   :  { %v446_v60 = vadd.f32 %v445_v59, %v378_v58  ;;  %v611_v61 = vpop.f32.mrb[1].mxu1 }
 0x1f4   :  { %v495_v62 = vmul.f32 -1.442695, %v446_v60 }
 0x1f6   :  { %667 = vpow2.f32 %v495_v62 }
 0x200   :  { %v668_v63 = vpop.eup %667 }
 0x201   :  { %v452_v0 = vadd.f32 1.0, %v668_v63 }
 0x203   :  { %669 = vrcp.f32 %v452_v0 }
 0x20d   :  { %v670_v46 = vpop.eup %669 }
 0x20e   :  { %456 = vst.msk [vmem:[#allocation3] sm:$0x1] %vm455_vm3, %v670_v46 }
 0x20f   :  { %682 = shalt.err (!%p679_p4)
}
 0x210   :  { %s683_s2 = scalar_lea.hbm %s919_s5, 16 }
 0x211   :  { %p684_p5 = scmp.ne.s32.totalorder %s919_s5, %s683_s2  ;;  %p687_p6 = scmp.lt.u32.totalorder %s683_s2, %s919_s5 }
 0x213   :  { %p689_p7 = pnand %p687_p6, %p684_p5 }
 0x215   :  { %692 = shalt.err (!%p689_p7)
}
 0x216   :  { %466 = dma.vmem_to_hbm [thread:$0]  %s464_s24, 16, %s919_s5, [#allocation4]  }
 0x217   :  { %693 = dma.done.wait [#allocation4], 16  }
 0x218   :  { %694 = vsyncadd [#allocation4], 4294967280 }
 0x219   :  { %470 = vsyncpa [#allocation4], 1 }

</bundles_post_ra>
